<compile_context>
chip_gen: v6e
topology: v6e:2x2x1
jax: 0.10.0
libtpu: 0.0.40
codegen_flags: <defaults>
</compile_context>

<pallas_src>
import jax
import jax.numpy as jnp
from jax import lax
from jax.experimental import pallas as pl
from jax.experimental.pallas import tpu as pltpu


_LANE = 128
_SMALL_PATH_BYTES = 4 * 1024 * 1024      # full-array fast path threshold (x2 buffered)
_VMEM_BUDGET = 26 * 1024 * 1024          # live buffer budget for the tiled paths
_VMEM_LIMIT = 40 * 1024 * 1024           # scoped-VMEM request (safe on v5e/v6e/v7x)
_TN_CAP = 1024
_TM_CAP = 512


def _round_up(x: int, m: int) -> int:
    return ((x + m - 1) // m) * m


def _row_align(dtype) -> int:
    # sublane packing: f32 -> 8 rows/vreg, bf16 -> 16, int8/fp8 -> 32
    return 8 * (4 // jnp.dtype(dtype).itemsize)


def _pick_tile(total: int, max_tile: int) -> int:
    """Largest multiple of 128 that divides `total` (a multiple of 128) and is
    <= max_tile.  Returns 0 if even 128 does not fit."""
    m = total // _LANE
    best = 0
    for d in range(1, m + 1):
        if m % d == 0 and _LANE * d <= max_tile:
            best = d
    return _LANE * best


# --------------------------------------------------------------------------- #
# Kernels
# --------------------------------------------------------------------------- #
def _projector_kernel_small(x_ref, w_ref, b_ref, o_ref):
    """Whole problem in one block: o = SiLU(x) @ W^T + b (no pad, no slice)."""
    xf = x_ref[...].astype(jnp.float32)
    a = (xf * jax.nn.sigmoid(xf)).astype(x_ref.dtype)
    acc = jnp.dot(a, w_ref[...], preferred_element_type=jnp.float32)
    o_ref[...] = (acc + b_ref[...].astype(jnp.float32)).astype(o_ref.dtype)


def _projector_kernel_fused_k(x_ref, w_ref, b_ref, o_ref, a_ref):
    """grid = (M tiles, N tiles); the whole K reduction lives in one block.

    SiLU(x) is computed once per M tile (at j == 0), cached in VMEM (a_ref, in
    the input dtype) and reused for every N tile.  The weight arrives already
    transposed to [in, out] so no in-kernel transpose is needed.
    """
    @pl.when(pl.program_id(1) == 0)
    def _():
        xf = x_ref[...].astype(jnp.float32)
        a_ref[...] = (xf * jax.nn.sigmoid(xf)).astype(x_ref.dtype)

    acc = jnp.dot(a_ref[...], w_ref[...], preferred_element_type=jnp.float32)
    o_ref[...] = (acc + b_ref[...].astype(jnp.float32)).astype(o_ref.dtype)


def _projector_kernel_split_k(x_ref, w_ref, b_ref, o_ref, acc_ref):
    """Fallback for very large K: grid = (M, N, K) with an f32 VMEM accumulator."""
    k = pl.program_id(2)

    @pl.when(k == 0)
    def _():
        acc_ref[...] = jnp.zeros_like(acc_ref)

    xf = x_ref[...].astype(jnp.float32)
    a = (xf * jax.nn.sigmoid(xf)).astype(x_ref.dtype)
    acc_ref[...] += jnp.dot(a, w_ref[...], preferred_element_type=jnp.float32)

    @pl.when(k == pl.num_programs(2) - 1)
    def _():
        o_ref[...] = (acc_ref[...] + b_ref[...].astype(jnp.float32)).astype(o_ref.dtype)


# --------------------------------------------------------------------------- #
# Wrapper
# --------------------------------------------------------------------------- #
def projector_forward(x, weight, bias):
    """x: [B, H_in]; weight: [H_out, H_in] (PyTorch nn.Linear layout); bias: [H_out]."""
    B, K = x.shape
    N, Kw = weight.shape
    assert K == Kw, "weight in_features must match x feature dim"
    assert bias.shape == (N,)

    itemsize = jnp.dtype(x.dtype).itemsize
    # One-time transpose of the static weight to [in, out]; avoids a per-tile
    # XLU transpose inside the kernel (the weight block is re-read per M tile).
    w_t = weight.T
    b2 = bias.reshape(1, N)

    # ---------- fast path: full-array blocks, no padding / no output slice ----
    arrays_bytes = (x.size + w_t.size + b2.size + B * N) * itemsize
    if 2 * arrays_bytes <= _SMALL_PATH_BYTES:
        cost = pl.CostEstimate(
            flops=2 * B * N * K,
            transcendentals=B * K,
            bytes_accessed=int(arrays_bytes))
        return pl.pallas_call(
            _projector_kernel_small,
            out_shape=jax.ShapeDtypeStruct((B, N), x.dtype),
            grid=(1,),
            in_specs=[
                pl.BlockSpec((B, K), lambda i: (0, 0)),   # x (full array)
                pl.BlockSpec((K, N), lambda i: (0, 0)),   # W^T (full array)
                pl.BlockSpec((1, N), lambda i: (0, 0)),   # bias
            ],
            out_specs=pl.BlockSpec((B, N), lambda i: (0, 0)),
            cost_estimate=cost,
        )(x, w_t, b2)

    # ---------- tiled paths ---------------------------------------------------
    row = _row_align(x.dtype)
    K_pad = _round_up(K, _LANE)
    N_pad = _round_up(N, _LANE)

    # Row tile: no row padding at all for B <= 512; for larger B pick 256/512
    # (whichever wastes less) so the MXU weight push is amortized over >=256 rows.
    if B <= _TM_CAP:
        TM = _round_up(B, row)
    else:
        TM = 256 if _round_up(B, 256) < _round_up(B, 512) else 512
    M_pad = _round_up(B, TM)
    M_tiles = M_pad // TM

    # --- preferred: whole K reduction in one block (gridK == 1) ---
    TK = K_pad
    fixed = 2 * TM * TK * itemsize + TM * TK * itemsize        # x (x2) + SiLU cache
    per_tn = 2 * TK * itemsize + 2 * TM * itemsize + 2 * itemsize   # w + out + bias
    tn_budget = (_VMEM_BUDGET - fixed) // per_tn if _VMEM_BUDGET > fixed else 0
    TN = _pick_tile(N_pad, min(_TN_CAP, int(tn_budget)))

    if TN >= _LANE:
        N_tiles = N_pad // TN
        xp = x if (M_pad == B and K_pad == K) else jnp.pad(
            x, ((0, M_pad - B), (0, K_pad - K)))
        wp = w_t if (K_pad == K and N_pad == N) else jnp.pad(
            w_t, ((0, K_pad - K), (0, N_pad - N)))
        bp = b2 if N_pad == N else jnp.pad(b2, ((0, 0), (0, N_pad - N)))

        cost = pl.CostEstimate(
            flops=2 * M_pad * N_pad * K_pad,
            transcendentals=M_pad * K_pad,                          # SiLU once per M tile
            bytes_accessed=int(M_pad * K_pad * itemsize             # x read once
                               + M_tiles * K_pad * N_pad * itemsize  # w re-read per M tile
                               + M_tiles * N_pad * itemsize          # bias
                               + M_pad * N_pad * itemsize))          # out

        out = pl.pallas_call(
            _projector_kernel_fused_k,
            out_shape=jax.ShapeDtypeStruct((M_pad, N_pad), x.dtype),
            grid=(M_tiles, N_tiles),
            in_specs=[
                pl.BlockSpec((TM, TK), lambda i, j: (i, 0)),   # x: constant across j
                pl.BlockSpec((TK, TN), lambda i, j: (0, j)),   # W^T [in, out]
                pl.BlockSpec((1, TN), lambda i, j: (0, j)),    # bias
            ],
            out_specs=pl.BlockSpec((TM, TN), lambda i, j: (i, j)),
            scratch_shapes=[pltpu.VMEM((TM, TK), x.dtype)],     # cached SiLU(x)
            compiler_params=pltpu.CompilerParams(
                # N axis must run sequentially within a core so the SiLU cache
                # written at j == 0 is valid for j > 0; M axis is megacore-parallel.
                dimension_semantics=("parallel", "arbitrary"),
                vmem_limit_bytes=_VMEM_LIMIT),
            cost_estimate=cost,
        )(xp, wp, bp)
        return out[:B, :N]

    # --- fallback: K too large to hold in one block -> split-K accumulator ---
    TK = _pick_tile(K_pad, 512)
    TN = _pick_tile(N_pad, 512)
    K_tiles = K_pad // TK
    N_tiles = N_pad // TN

    xp = x if (M_pad == B and K_pad == K) else jnp.pad(
        x, ((0, M_pad - B), (0, K_pad - K)))
    wp = w_t if (K_pad == K and N_pad == N) else jnp.pad(
        w_t, ((0, K_pad - K), (0, N_pad - N)))
    bp = b2 if N_pad == N else jnp.pad(b2, ((0, 0), (0, N_pad - N)))

    cost = pl.CostEstimate(
        flops=2 * M_pad * N_pad * K_pad,
        transcendentals=M_pad * K_pad * N_tiles,                    # recomputed per N tile
        bytes_accessed=int(M_pad * K_pad * itemsize * N_tiles       # x re-read per N tile
                           + K_pad * N_pad * itemsize * M_tiles     # w re-read per M tile
                           + M_tiles * K_tiles * N_pad * itemsize   # bias
                           + M_pad * N_pad * itemsize))             # out

    out = pl.pallas_call(
        _projector_kernel_split_k,
        out_shape=jax.ShapeDtypeStruct((M_pad, N_pad), x.dtype),
        grid=(M_tiles, N_tiles, K_tiles),
        in_specs=[
            pl.BlockSpec((TM, TK), lambda i, j, k: (i, k)),
            pl.BlockSpec((TK, TN), lambda i, j, k: (k, j)),
            pl.BlockSpec((1, TN), lambda i, j, k: (0, j)),
        ],
        out_specs=pl.BlockSpec((TM, TN), lambda i, j, k: (i, j)),
        scratch_shapes=[pltpu.VMEM((TM, TN), jnp.float32)],
        compiler_params=pltpu.CompilerParams(
            dimension_semantics=("parallel", "parallel", "arbitrary"),
            vmem_limit_bytes=_VMEM_LIMIT),
        cost_estimate=cost,
    )(xp, wp, bp)
    return out[:B, :N]


# --------------------------------------------------------------------------- #
# Reference + tests
# --------------------------------------------------------------------------- #
def _reference(x, weight, bias):
    a = x * jax.nn.sigmoid(x)
    return jnp.dot(a, weight.T, precision=lax.Precision.HIGHEST) + bias


def _make_case(key, batch, out_dim, in_dim):
    kx, kw, kb = jax.random.split(key, 3)
    bound = 1.0 / (in_dim ** 0.5)
    w = jax.random.uniform(kw, (out_dim, in_dim), minval=-bound, maxval=bound,
                           dtype=jnp.float32)
    b = jax.random.uniform(kb, (out_dim,), minval=-bound, maxval=bound,
                           dtype=jnp.float32)
    x = jax.random.normal(kx, (batch, in_dim), dtype=jnp.float32)
    return x, w, b


if __name__ == "__main__":
    root = jax.random.PRNGKey(0)
    k0, k1, k2 = jax.random.split(root, 3)

    # --- Primary check: the actual SwitchTab Projector shape (small fast path,
    #     full-array blocks, no padding). ---
    hidden_dim, batch = 32, 8
    x, w, b = _make_case(k0, batch, hidden_dim, hidden_dim)
    out = jax.block_until_ready(projector_forward(x, w, b))
    ref = _reference(x, w, b)
    assert out.shape == (batch, hidden_dim)
    assert jnp.allclose(out, ref, atol=1e-5, rtol=1e-5)

    # --- Secondary check: tiled fused-K path with multiple M and N tiles
    #     (exercises the cached-SiLU scratch, M/N/K padding, megacore split). ---
    h2, b2 = 1250, 600
    x2, w2, bi2 = _make_case(k1, b2, h2, h2)
    out2 = jax.block_until_ready(projector_forward(x2, w2, bi2))
    ref2 = _reference(x2, w2, bi2)
    assert out2.shape == (b2, h2)
    assert jnp.allclose(out2, ref2, atol=5e-4, rtol=5e-4)

    # --- Third check: huge-K shape forcing the split-K accumulator fallback. ---
    k_in, n_out, b3 = 20480, 128, 32
    x3, w3, bi3 = _make_case(k2, b3, n_out, k_in)
    out3 = jax.block_until_ready(projector_forward(x3, w3, bi3))
    ref3 = _reference(x3, w3, bi3)
    assert out3.shape == (b3, n_out)
    assert jnp.allclose(out3, ref3, atol=1e-3, rtol=1e-3)

    print("KERNEL_OK")
</pallas_src>

<mosaic_0001>
module attributes {stable_mosaic.version = 11 : i64} {
  func.func @_projector_kernel_small(%arg0: i32, %arg1: memref<8x32xf32, #tpu.memory_space<vmem>>, %arg2: memref<32x32xf32, #tpu.memory_space<vmem>>, %arg3: memref<1x32xf32, #tpu.memory_space<vmem>>, %arg4: memref<8x32xf32, #tpu.memory_space<vmem>>) attributes {dimension_semantics = [#tpu.dimension_semantics<arbitrary>], iteration_bounds = array<i64: 1>, scalar_prefetch = 0 : i64, scratch_operands = 0 : i64, tpu.core_type = #tpu.core_type<tc>, window_params = [{pipeline_mode = #tpu.pipeline_mode<synchronous>, transform_indices = @transform_0, window_bounds = array<i64: 8, 32>}, {pipeline_mode = #tpu.pipeline_mode<synchronous>, transform_indices = @transform_1, window_bounds = array<i64: 32, 32>}, {pipeline_mode = #tpu.pipeline_mode<synchronous>, transform_indices = @transform_2, window_bounds = array<i64: 1, 32>}, {pipeline_mode = #tpu.pipeline_mode<synchronous>, transform_indices = @transform_3, window_bounds = array<i64: 8, 32>}]} {
    %c0 = arith.constant 0 : index
    %c0_0 = arith.constant 0 : index
    %0 = vector.load %arg1[%c0, %c0_0] : memref<8x32xf32, #tpu.memory_space<vmem>>, vector<8x32xf32>
    %1 = arith.negf %0 : vector<8x32xf32>
    %2 = math.exp %1 : vector<8x32xf32>
    %cst = arith.constant 1.000000e+00 : f32
    %3 = vector.broadcast %cst : f32 to vector<8x32xf32>
    %4 = arith.addf %3, %2 : vector<8x32xf32>
    %5 = arith.divf %3, %4 : vector<8x32xf32>
    %6 = arith.mulf %0, %5 : vector<8x32xf32>
    %c0_1 = arith.constant 0 : index
    %c0_2 = arith.constant 0 : index
    %7 = vector.load %arg2[%c0_1, %c0_2] : memref<32x32xf32, #tpu.memory_space<vmem>>, vector<32x32xf32>
    %cst_3 = arith.constant dense<0.000000e+00> : vector<8x32xf32>
    %8 = tpu.matmul %6, %7, %cst_3 {dimension_numbers = #tpu.dot_dimension_numbers<[1], [0], [0], [1], [0, 0, 1, 1], [], []>} : vector<8x32xf32>, vector<32x32xf32>, vector<8x32xf32> -> vector<8x32xf32>
    %c0_4 = arith.constant 0 : index
    %c0_5 = arith.constant 0 : index
    %9 = vector.load %arg3[%c0_4, %c0_5] : memref<1x32xf32, #tpu.memory_space<vmem>>, vector<1x32xf32>
    %10 = vector.broadcast %9 : vector<1x32xf32> to vector<8x32xf32>
    %11 = arith.addf %8, %10 : vector<8x32xf32>
    %c0_6 = arith.constant 0 : index
    %c0_7 = arith.constant 0 : index
    %12 = vector.load %arg4[%c0_6, %c0_7] : memref<8x32xf32, #tpu.memory_space<vmem>>, vector<8x32xf32>
    tpu.vector_store %arg4[%c0_6, %c0_7], %11 {strides = array<i32>} : memref<8x32xf32, #tpu.memory_space<vmem>>, vector<8x32xf32>,
    return
  }
  func.func @transform_0(%arg0: i32) -> (i32, i32) {
    %c0_i32 = arith.constant 0 : i32
    %c0_i32_0 = arith.constant 0 : i32
    %c0_i32_1 = arith.constant 0 : i32
    return %c0_i32, %c0_i32_0 : i32, i32
  }
  func.func @transform_1(%arg0: i32) -> (i32, i32) {
    %c0_i32 = arith.constant 0 : i32
    %c0_i32_0 = arith.constant 0 : i32
    %c0_i32_1 = arith.constant 0 : i32
    return %c0_i32, %c0_i32_0 : i32, i32
  }
  func.func @transform_2(%arg0: i32) -> (i32, i32) {
    %c0_i32 = arith.constant 0 : i32
    %c0_i32_0 = arith.constant 0 : i32
    %c0_i32_1 = arith.constant 0 : i32
    return %c0_i32, %c0_i32_0 : i32, i32
  }
  func.func @transform_3(%arg0: i32) -> (i32, i32) {
    %c0_i32 = arith.constant 0 : i32
    %c0_i32_0 = arith.constant 0 : i32
    %c0_i32_1 = arith.constant 0 : i32
    return %c0_i32, %c0_i32_0 : i32, i32
  }
}

</mosaic_0001>

<bundles_post_ra>
// kernel: tpu_custom_call.1
= control target key start
LH: loop header
LB: loop body
LE: loop exit
PB: predicated region body
PF: predicated region fallthrough
CT: control target
= control target key end

     0   :  { %8 = vsyncpa [#allocation3], 0  ;;  %s286_s0 = inlined_call_operand.hbm [shape: f32[8,32], index: 0, kind: input, shape index: {}]   ;;  %s287_s1 = inlined_call_operand.hbm [shape: f32[32,32], index: 1, kind: input, shape index: {}]   ;;  %s288_s2 = inlined_call_operand.vmem [shape: f32[1,32], index: 2, kind: input, shape index: {}]   ;;  %s289_s3 = inlined_call_operand.hbm [shape: f32[8,32], index: 3, kind: output, shape index: {}]  }
   0x1   :  { %9 = vsyncpa [#allocation6], 0 }
   0x2   :  { %10 = vsyncpa [#allocation4], 0  ;;  %s247_s12 = smov [#allocation2]   ;;  %s248_s14 = smov [#allocation5]  }
   0x3   :  { %s17_s13 = sshll.u32 %s247_s12, 4  ;;  %s26_s15 = sshll.u32 %s248_s14, 4  ;;  %s18_s13 = int_to_ptr.vmem [resolvable:$true] %s17_s13  ;;  %s27_s15 = int_to_ptr.vmem [resolvable:$true] %s26_s15 }
   0x4   :  { %s189_s16 = scalar_lea.vmem %s18_s13, 128  ;;  %p194_p1 = scmp.lt.s32.totalorder %s18_s13, %s18_s13 }
   0x5   :  { %p190_p0 = scmp.ne.s32.totalorder %s18_s13, %s189_s16  ;;  %p195_p2 = scmp.lt.s32.totalorder %s189_s16, %s189_s16 }
   0x7   :  { %p196_p3 = por %p195_p2, %p194_p1 }
   0x9   :  { %p197_p4 = pnand %p196_p3, %p190_p0 }
   0xb   :  { %200 = shalt.err (!%p197_p4)
}
   0xc   :  { %20 = dma.hbm_to_vmem [thread:$0]  %s286_s0, 128, %s18_s13, [#allocation3]  }
   0xd   :  { %s209_s19 = scalar_lea.vmem %s27_s15, 512  ;;  %p214_p6 = scmp.lt.s32.totalorder %s27_s15, %s27_s15 }
   0xe   :  { %p210_p5 = scmp.ne.s32.totalorder %s27_s15, %s209_s19  ;;  %p215_p7 = scmp.lt.s32.totalorder %s209_s19, %s209_s19 }
  0x10   :  { %p216_p8 = por %p215_p7, %p214_p6 }
  0x12   :  { %p217_p9 = pnand %p216_p8, %p210_p5 }
  0x14   :  { %220 = shalt.err (!%p217_p9)
}
  0x15   :  { %s249_s20 = smov 128   ;;  %s250_s21 = smov 8  }
  0x16   :  { %32 = dma.hbm_to_vmem [thread:$0]  %s287_s1, 512, %s27_s15, [#allocation6], %s249_s20, %s249_s20, %s250_s21  }
  0x17   :  { %241 = dma.done.wait [#allocation3], 128  }
  0x18   :  { %242 = vsyncadd [#allocation3], 4294967168 }
  0x19   :  { %243 = dma.done.wait [#allocation6], 512  }
  0x1a   :  { %244 = vsyncadd [#allocation6], 4294966784  ;;  %v251_v0 = vmov 0.0   ;;  %vm252_vm0 = vmmov 0   ;;  %v52_v1 = vld [vmem:[#allocation5 + $0x18] sm:$0xff]  ;;  %v51_v2 = vld [vmem:[#allocation5 + $0x10] sm:$0xff] }
  0x1b   :  { %159 = vmatprep.subr.mxu0 %v251_v0  ;;  %167 = vmatprep.mubr.msk.f32.mxu0 %vm252_vm0, %v251_v0  ;;  %v41_v3 = vld [vmem:[#allocation2] sm:$0xff]  ;;  %v50_v4 = vld [vmem:[#allocation5 + $0x8] sm:$0xff]  ;;  %v49_v6 = vld [vmem:[#allocation5] sm:$0xff]  ;;  %vm60_vm1 = vcmask 261120   ;;  %s253_s24 = smov [#allocation7]  }
  0x1c   :  { %160 = vmatpush3.msra.mxu0 %v52_v1  ;;  %v151_v5 = vmul.f32 -1.442695, %v41_v3  ;;  %v152_v11 = vld [vmem:[%s288_s2] ss:$0 sm:$0xff]  ;;  %s141_s25 = sshll.u32 %s253_s24, 4  ;;  %s142_s25 = int_to_ptr.vmem [resolvable:$true] %s141_s25 }
  0x1d   :  { %161 = vmatprep.subr.mxu0 %v251_v0  ;;  %s221_s26 = scalar_lea.vmem %s142_s25, 128  ;;  %p226_p11 = scmp.lt.s32.totalorder %s142_s25, %s142_s25 }
  0x1e   :  { %162 = vmatpush3.msra.mxu0 %v51_v2  ;;  %177 = vpow2.f32 %v151_v5  ;;  %p222_p10 = scmp.ne.s32.totalorder %s142_s25, %s221_s26  ;;  %p227_p12 = scmp.lt.s32.totalorder %s221_s26, %s221_s26 }
  0x1f   :  { %163 = vmatprep.subr.mxu0 %v251_v0 }
  0x20   :  { %164 = vmatpush3.msra.mxu0 %v50_v4  ;;  %p228_p13 = por %p227_p12, %p226_p11 }
  0x21   :  { %165 = vmatprep.subr.mxu0 %v251_v0 }
  0x22   :  { %166 = vmatpush3.msra.mxu0 %v49_v6  ;;  %p229_p0 = pnand %p228_p13, %p222_p10 }
  0x2b   :  { %v178_v7 = vpop.eup %177 }
  0x2c   :  { %v45_v8 = vadd.f32 1.0, %v178_v7 }
  0x2e   :  { %179 = vrcp.f32 %v45_v8 }
  0x3b   :  { %v180_v9 = vpop.eup %179 }
  0x3c   :  { %v48_v10 = vmul.f32 %v180_v9, %v41_v3 }
  0x3e   :  { %168 = vmatmul.mubr.msk.f32.vlgmr.msra.gmra.mxu0 %vm60_vm1, %v48_v10 }
  0xfe   :  { %v130_v12 = vpop.f32.mrf.mxu0 }
  0xff   :  { %v131_v13 = vadd.f32 %v152_v11, %v130_v12 }
 0x100   :  { %v169_v14 = vpop.f32.mrf.mxu0 }
 0x101   :  { %134 = vst.msk [vmem:[#allocation7] sm:$0xff] %vm60_vm1, %v131_v13 }
 0x102   :  { %232 = shalt.err (!%p229_p0)
}
 0x103   :  { %144 = dma.vmem_to_hbm [thread:$0]  %s142_s25, 128, %s289_s3, [#allocation4]  }
 0x104   :  { %245 = dma.done.wait [#allocation4], 128  }
 0x105   :  { %246 = vsyncadd [#allocation4], 4294967168 }
 0x106   :  { %148 = vsyncpa [#allocation3], 1 }
 0x107   :  { %149 = vsyncpa [#allocation6], 1 }
 0x108   :  { %150 = vsyncpa [#allocation4], 1 }

</bundles_post_ra>
